<compile_context>
chip_gen: v7x
topology: tpu7x:2x2x1
jax: 0.10.0
libtpu: 0.0.40
codegen_flags: <defaults>
</compile_context>

<pallas_src>
import functools

import numpy as np
import jax
import jax.numpy as jnp
from jax.experimental import pallas as pl
from jax.experimental.pallas import tpu as pltpu


def _round_up(x, m):
    return ((x + m - 1) // m) * m


# ---------------------------------------------------------------------------
# Fused kernel:  out = relu(Xa @ Wa' + shift_a) + relu(Xb @ Wb' + shift_b)
# (BN scale already folded into Wa'/Wb'; shifts are the folded BN offsets.)
# ---------------------------------------------------------------------------
def _tu_fused_kernel(xa_ref, xb_ref, wa_ref, wb_ref, sa_ref, sb_ref, o_ref):
    ya = jnp.dot(xa_ref[...], wa_ref[...], preferred_element_type=jnp.float32)
    yb = jnp.dot(xb_ref[...], wb_ref[...], preferred_element_type=jnp.float32)
    ya = jnp.maximum(ya + sa_ref[...], 0.0)
    yb = jnp.maximum(yb + sb_ref[...], 0.0)
    o_ref[...] = (ya + yb).astype(o_ref.dtype)


def fused_tu_matmul(xa, xb, wa, wb, shift_a, shift_b, *,
                    out_dtype=jnp.float32, tm=1024,
                    vmem_cap_bytes=48 * 1024 * 1024):
    """xa: [M, Ka], xb: [M, Kb], wa: [Ka, N], wb: [Kb, N] (block-diagonal),
    shift_*: [1, N] float32.  Returns [M, N] (= relu(a)+relu(b))."""
    M, Ka = xa.shape
    Mb, Kb = xb.shape
    N = wa.shape[1]
    assert Mb == M and wb.shape == (Kb, N)
    assert shift_a.shape == (1, N) and shift_b.shape == (1, N)

    xa_sz = np.dtype(xa.dtype).itemsize
    xb_sz = np.dtype(xb.dtype).itemsize
    w_sz = np.dtype(wa.dtype).itemsize
    out_sz = np.dtype(out_dtype).itemsize
    # sublane alignment for the M-tile (bf16 needs 16, f32 needs 8)
    align = 16 if min(xa_sz, xb_sz) < 4 else 8

    # Large M tile (layer is memory-bound; big tiles amortize per-step
    # overhead), but keep >= 2 tiles when possible so both v7x TensorCores
    # get work.
    tm_eff = max(align, min(_round_up(tm, align),
                            _round_up(pl.cdiv(M, 2), align)))

    def vmem_need(t):
        # double-buffered activation/output tiles + resident weights
        # (conservatively counted double-buffered) + compiler-scratch headroom.
        tiles = 2 * t * (Ka * xa_sz + Kb * xb_sz + N * out_sz)
        weights = 2 * ((Ka * N + Kb * N) * w_sz + 2 * N * 4)
        return tiles + weights + (2 << 20)

    # Shrink the tile until the working set fits the (cross-generation safe)
    # VMEM cap: 48 MiB < v7x's 64 MiB physical, well within v5e/v6e.
    while vmem_need(tm_eff) > vmem_cap_bytes and tm_eff > align:
        tm_eff = max(align, _round_up(tm_eff // 2, align))

    Mp = _round_up(M, tm_eff)
    if Mp != M:  # zero-pad the tail tile (sliced off after the call)
        pad = Mp - M
        xa = jnp.pad(xa, ((0, pad), (0, 0)))
        xb = jnp.pad(xb, ((0, pad), (0, 0)))

    grid = (Mp // tm_eff,)
    cost = pl.CostEstimate(
        flops=2 * Mp * (Ka + Kb) * N,
        transcendentals=0,
        bytes_accessed=int(Mp * Ka * xa_sz + Mp * Kb * xb_sz
                           + (Ka + Kb) * N * w_sz + 2 * N * 4
                           + Mp * N * out_sz),
    )

    out = pl.pallas_call(
        _tu_fused_kernel,
        out_shape=jax.ShapeDtypeStruct((Mp, N), out_dtype),
        grid_spec=pltpu.PrefetchScalarGridSpec(
            num_scalar_prefetch=0,
            grid=grid,
            in_specs=[
                pl.BlockSpec((tm_eff, Ka), lambda i: (i, 0)),   # activations a
                pl.BlockSpec((tm_eff, Kb), lambda i: (i, 0)),   # activations b
                pl.BlockSpec((Ka, N), lambda i: (0, 0)),        # weights a (resident)
                pl.BlockSpec((Kb, N), lambda i: (0, 0)),        # weights b (resident)
                pl.BlockSpec((1, N), lambda i: (0, 0)),         # BN shift a (f32)
                pl.BlockSpec((1, N), lambda i: (0, 0)),         # BN shift b (f32)
            ],
            out_specs=pl.BlockSpec((tm_eff, N), lambda i: (i, 0)),
        ),
        compiler_params=pltpu.CompilerParams(
            dimension_semantics=("parallel",),
            vmem_limit_bytes=int(vmem_cap_bytes),
        ),
        cost_estimate=cost,
    )(xa, xb, wa, wb, shift_a, shift_b)

    return out[:M] if Mp != M else out


# ---------------------------------------------------------------------------
# Parameter init (deterministic, synthetic)
# ---------------------------------------------------------------------------
def init_tulayer_params(key, input_a_dim, input_b_dim, out_dim):
    ka, kb, kg1, kb1, kg2, kb2 = jax.random.split(key, 6)
    params = {
        # ConvTranspose3d k=2,s=2: 8 kernel offsets, each [Cin_a, Cout]
        "Wa": 0.1 * jax.random.normal(ka, (8, input_a_dim, out_dim), jnp.float32),
        # 1x1x1 conv: [Cin_b, Cout]
        "Wb": 0.1 * jax.random.normal(kb, (input_b_dim, out_dim), jnp.float32),
        # BatchNorm (inference) params for each branch
        "gamma_a": jax.random.uniform(kg1, (out_dim,), jnp.float32, 0.5, 1.5),
        "beta_a": 0.1 * jax.random.normal(kb1, (out_dim,), jnp.float32),
        "mean_a": 0.01 * jnp.arange(out_dim, dtype=jnp.float32),
        "var_a": 1.0 + 0.05 * jnp.arange(out_dim, dtype=jnp.float32),
        "gamma_b": jax.random.uniform(kg2, (out_dim,), jnp.float32, 0.5, 1.5),
        "beta_b": 0.1 * jax.random.normal(kb2, (out_dim,), jnp.float32),
        "mean_b": -0.01 * jnp.arange(out_dim, dtype=jnp.float32),
        "var_b": 1.0 + 0.03 * jnp.arange(out_dim, dtype=jnp.float32),
    }
    return params


# ---------------------------------------------------------------------------
# TULayer forward (dense-grid equivalent of the SUM_FEATURE branch)
# ---------------------------------------------------------------------------
def tu_layer_forward(x_a, x_b, params, eps=1e-5, tm=1024, compute_dtype=None):
    # x_a: [B, Ca, D, H, W]    (coarse grid, upsampled 2x by the transposed conv)
    # x_b: [B, Cb, 2D, 2H, 2W] (fine grid skip connection)
    B, Ca, D, H, W = x_a.shape
    Bb, Cb, D2, H2, W2 = x_b.shape
    assert B == Bb and (D2, H2, W2) == (2 * D, 2 * H, 2 * W)
    Cout = params["Wa"].shape[-1]
    Mc = B * D * H * W
    N = 8 * Cout
    result_dtype = x_a.dtype

    # ---- fold BatchNorm (inference) into weights / shifts (tiny, one-time) --
    scale_a = params["gamma_a"] / jnp.sqrt(params["var_a"] + eps)
    shift_a = params["beta_a"] - params["mean_a"] * scale_a
    scale_b = params["gamma_b"] / jnp.sqrt(params["var_b"] + eps)
    shift_b = params["beta_b"] - params["mean_b"] * scale_b

    # ConvTranspose weights [8, Ca, Cout] -> [Ca, 8*Cout], offset-major columns,
    # with the BN scale folded into each output column.
    Wa_flat = jnp.transpose(params["Wa"], (1, 0, 2)).reshape(Ca, N)
    Wa_flat = Wa_flat * jnp.tile(scale_a, 8)[None, :]
    # 1x1 conv weight shared across the 8 offsets -> block-diagonal [8*Cb, 8*Cout]
    # so branch b is a single MXU matmul in the same column ordering.
    Wb_blk = jnp.kron(jnp.eye(8, dtype=params["Wb"].dtype),
                      params["Wb"] * scale_b[None, :])
    shift_a_t = jnp.tile(shift_a, 8).reshape(1, N).astype(jnp.float32)
    shift_b_t = jnp.tile(shift_b, 8).reshape(1, N).astype(jnp.float32)

    # ---- channels-last activations: rows = coarse voxels ---------------------
    Xa = jnp.transpose(x_a, (0, 2, 3, 4, 1)).reshape(Mc, Ca)
    # x_b gathered into (coarse voxel, offset-major) order so both branches
    # share one grid: column k*Cb + c with k = 4*di + 2*dj + dk.
    Xb = x_b.reshape(B, Cb, D, 2, H, 2, W, 2)
    Xb = jnp.transpose(Xb, (0, 2, 4, 6, 3, 5, 7, 1)).reshape(Mc, 8 * Cb)

    if compute_dtype is not None:  # bf16 storage/compute (v6e/v7x lever)
        Xa = Xa.astype(compute_dtype)
        Xb = Xb.astype(compute_dtype)
        Wa_flat = Wa_flat.astype(compute_dtype)
        Wb_blk = Wb_blk.astype(compute_dtype)

    # one fused kernel: both matmuls + BN shift + ReLUs + sum, lane-dense store
    Y = fused_tu_matmul(Xa, Xb, Wa_flat, Wb_blk, shift_a_t, shift_b_t,
                        out_dtype=result_dtype, tm=tm)        # [Mc, 8*Cout]

    # single XLA shuffle: interleave the 8 offsets onto the 2x grid AND go back
    # to channels-first NCDHW in one pass over the fine tensor.
    Y = Y.reshape(B, D, H, W, 2, 2, 2, Cout)
    Y = jnp.transpose(Y, (0, 7, 1, 4, 2, 5, 3, 6)).reshape(B, Cout, D2, H2, W2)
    return Y


# ---------------------------------------------------------------------------
# Pure-JAX reference for correctness checking
# ---------------------------------------------------------------------------
def tu_layer_reference(x_a, x_b, params, eps=1e-5):
    B, Ca, D, H, W = x_a.shape
    _, Cb, D2, H2, W2 = x_b.shape
    Cout = params["Wa"].shape[-1]

    Xa = jnp.transpose(x_a, (0, 2, 3, 4, 1))                       # B,D,H,W,Ca
    ya = jnp.einsum("bdhwc,kco->bdhwko", Xa, params["Wa"])         # k = 8 offsets
    scale_a = params["gamma_a"] / jnp.sqrt(params["var_a"] + eps)
    shift_a = params["beta_a"] - params["mean_a"] * scale_a
    ya = jnp.maximum(ya * scale_a + shift_a, 0.0)
    ya = ya.reshape(B, D, H, W, 2, 2, 2, Cout)
    ya = jnp.transpose(ya, (0, 1, 4, 2, 5, 3, 6, 7)).reshape(B, D2, H2, W2, Cout)

    Xb = jnp.transpose(x_b, (0, 2, 3, 4, 1))                       # B,2D,2H,2W,Cb
    yb = jnp.einsum("bdhwc,co->bdhwo", Xb, params["Wb"])
    scale_b = params["gamma_b"] / jnp.sqrt(params["var_b"] + eps)
    shift_b = params["beta_b"] - params["mean_b"] * scale_b
    yb = jnp.maximum(yb * scale_b + shift_b, 0.0)

    return jnp.transpose(ya + yb, (0, 4, 1, 2, 3))                 # NCDHW


# ---------------------------------------------------------------------------
if __name__ == "__main__":
    key = jax.random.PRNGKey(0)
    k_params, k_a, k_b = jax.random.split(key, 3)

    B = 2
    # 8 * out_dim = 128  ->  lane-dense kernel stores even at demo size
    input_a_dim, input_b_dim, out_dim = 16, 8, 16
    D = H = W = 4                       # coarse grid; fine grid is 8x8x8

    params = init_tulayer_params(k_params, input_a_dim, input_b_dim, out_dim)
    x_a = jax.random.normal(k_a, (B, input_a_dim, D, H, W), jnp.float32)
    x_b = jax.random.normal(k_b, (B, input_b_dim, 2 * D, 2 * H, 2 * W), jnp.float32)

    ref = tu_layer_reference(x_a, x_b, params)

    # f32 path (default; tight check vs reference)
    fwd = jax.jit(functools.partial(tu_layer_forward, params=params))
    out = jax.block_until_ready(fwd(x_a, x_b))
    assert out.shape == (B, out_dim, 2 * D, 2 * H, 2 * W), out.shape
    assert jnp.allclose(out, ref, atol=1e-4, rtol=1e-4), "f32 mismatch vs reference"

    # bf16 storage/compute path (v6e/v7x bandwidth lever; f32 accumulation)
    fwd_bf16 = jax.jit(functools.partial(tu_layer_forward, params=params,
                                         compute_dtype=jnp.bfloat16))
    out_bf16 = jax.block_until_ready(fwd_bf16(x_a, x_b))
    assert jnp.allclose(out_bf16, ref, atol=1e-1, rtol=1e-1), "bf16 mismatch vs reference"

    print("KERNEL_OK")
</pallas_src>

<mosaic_0001>
module attributes {stable_mosaic.version = 11 : i64} {
  func.func @_tu_fused_kernel(%arg0: i32, %arg1: memref<64x16xf32, #tpu.memory_space<vmem>>, %arg2: memref<64x64xf32, #tpu.memory_space<vmem>>, %arg3: memref<16x128xf32, #tpu.memory_space<vmem>>, %arg4: memref<64x128xf32, #tpu.memory_space<vmem>>, %arg5: memref<1x128xf32, #tpu.memory_space<vmem>>, %arg6: memref<1x128xf32, #tpu.memory_space<vmem>>, %arg7: memref<64x128xf32, #tpu.memory_space<vmem>>) attributes {dimension_semantics = [#tpu.dimension_semantics<parallel>], iteration_bounds = array<i64: 2>, scalar_prefetch = 0 : i64, scratch_operands = 0 : i64, tpu.core_type = #tpu.core_type<tc>, window_params = [{transform_indices = @transform_0, window_bounds = array<i64: 64, 16>}, {transform_indices = @transform_1, window_bounds = array<i64: 64, 64>}, {pipeline_mode = #tpu.pipeline_mode<synchronous>, transform_indices = @transform_2, window_bounds = array<i64: 16, 128>}, {pipeline_mode = #tpu.pipeline_mode<synchronous>, transform_indices = @transform_3, window_bounds = array<i64: 64, 128>}, {pipeline_mode = #tpu.pipeline_mode<synchronous>, transform_indices = @transform_4, window_bounds = array<i64: 1, 128>}, {pipeline_mode = #tpu.pipeline_mode<synchronous>, transform_indices = @transform_5, window_bounds = array<i64: 1, 128>}, {transform_indices = @transform_6, window_bounds = array<i64: 64, 128>}]} {
    %c0 = arith.constant 0 : index
    %c0_0 = arith.constant 0 : index
    %0 = vector.load %arg1[%c0, %c0_0] : memref<64x16xf32, #tpu.memory_space<vmem>>, vector<64x16xf32>
    %c0_1 = arith.constant 0 : index
    %c0_2 = arith.constant 0 : index
    %1 = vector.load %arg3[%c0_1, %c0_2] : memref<16x128xf32, #tpu.memory_space<vmem>>, vector<16x128xf32>
    %cst = arith.constant dense<0.000000e+00> : vector<64x128xf32>
    %2 = tpu.matmul %0, %1, %cst {dimension_numbers = #tpu.dot_dimension_numbers<[1], [0], [0], [1], [0, 0, 1, 1], [], []>} : vector<64x16xf32>, vector<16x128xf32>, vector<64x128xf32> -> vector<64x128xf32>
    %c0_3 = arith.constant 0 : index
    %c0_4 = arith.constant 0 : index
    %3 = vector.load %arg2[%c0_3, %c0_4] : memref<64x64xf32, #tpu.memory_space<vmem>>, vector<64x64xf32>
    %c0_5 = arith.constant 0 : index
    %c0_6 = arith.constant 0 : index
    %4 = vector.load %arg4[%c0_5, %c0_6] : memref<64x128xf32, #tpu.memory_space<vmem>>, vector<64x128xf32>
    %cst_7 = arith.constant dense<0.000000e+00> : vector<64x128xf32>
    %5 = tpu.matmul %3, %4, %cst_7 {dimension_numbers = #tpu.dot_dimension_numbers<[1], [0], [0], [1], [0, 0, 1, 1], [], []>} : vector<64x64xf32>, vector<64x128xf32>, vector<64x128xf32> -> vector<64x128xf32>
    %c0_8 = arith.constant 0 : index
    %c0_9 = arith.constant 0 : index
    %6 = vector.load %arg5[%c0_8, %c0_9] : memref<1x128xf32, #tpu.memory_space<vmem>>, vector<1x128xf32>
    %7 = vector.broadcast %6 : vector<1x128xf32> to vector<64x128xf32>
    %8 = arith.addf %2, %7 : vector<64x128xf32>
    %cst_10 = arith.constant 0.000000e+00 : f32
    %9 = vector.broadcast %cst_10 : f32 to vector<64x128xf32>
    %10 = arith.maximumf %8, %9 : vector<64x128xf32>
    %c0_11 = arith.constant 0 : index
    %c0_12 = arith.constant 0 : index
    %11 = vector.load %arg6[%c0_11, %c0_12] : memref<1x128xf32, #tpu.memory_space<vmem>>, vector<1x128xf32>
    %12 = vector.broadcast %11 : vector<1x128xf32> to vector<64x128xf32>
    %13 = arith.addf %5, %12 : vector<64x128xf32>
    %cst_13 = arith.constant 0.000000e+00 : f32
    %14 = vector.broadcast %cst_13 : f32 to vector<64x128xf32>
    %15 = arith.maximumf %13, %14 : vector<64x128xf32>
    %16 = arith.addf %10, %15 : vector<64x128xf32>
    %c0_14 = arith.constant 0 : index
    %c0_15 = arith.constant 0 : index
    %17 = vector.load %arg7[%c0_14, %c0_15] : memref<64x128xf32, #tpu.memory_space<vmem>>, vector<64x128xf32>
    tpu.vector_store %arg7[%c0_14, %c0_15], %16 {strides = array<i32>} : memref<64x128xf32, #tpu.memory_space<vmem>>, vector<64x128xf32>,
    return
  }
  func.func @transform_0(%arg0: i32) -> (i32, i32) {
    %c0_i32 = arith.constant 0 : i32
    %c0_i32_0 = arith.constant 0 : i32
    return %arg0, %c0_i32 : i32, i32
  }
  func.func @transform_1(%arg0: i32) -> (i32, i32) {
    %c0_i32 = arith.constant 0 : i32
    %c0_i32_0 = arith.constant 0 : i32
    return %arg0, %c0_i32 : i32, i32
  }
  func.func @transform_2(%arg0: i32) -> (i32, i32) {
    %c0_i32 = arith.constant 0 : i32
    %c0_i32_0 = arith.constant 0 : i32
    %c0_i32_1 = arith.constant 0 : i32
    return %c0_i32, %c0_i32_0 : i32, i32
  }
  func.func @transform_3(%arg0: i32) -> (i32, i32) {
    %c0_i32 = arith.constant 0 : i32
    %c0_i32_0 = arith.constant 0 : i32
    %c0_i32_1 = arith.constant 0 : i32
    return %c0_i32, %c0_i32_0 : i32, i32
  }
  func.func @transform_4(%arg0: i32) -> (i32, i32) {
    %c0_i32 = arith.constant 0 : i32
    %c0_i32_0 = arith.constant 0 : i32
    %c0_i32_1 = arith.constant 0 : i32
    return %c0_i32, %c0_i32_0 : i32, i32
  }
  func.func @transform_5(%arg0: i32) -> (i32, i32) {
    %c0_i32 = arith.constant 0 : i32
    %c0_i32_0 = arith.constant 0 : i32
    %c0_i32_1 = arith.constant 0 : i32
    return %c0_i32, %c0_i32_0 : i32, i32
  }
  func.func @transform_6(%arg0: i32) -> (i32, i32) {
    %c0_i32 = arith.constant 0 : i32
    %c0_i32_0 = arith.constant 0 : i32
    return %arg0, %c0_i32 : i32, i32
  }
}

</mosaic_0001>

<bundles_post_ra>
// kernel: tile.14
= control target key start
LH: loop header
LB: loop body
LE: loop exit
PB: predicated region body
PF: predicated region fallthrough
CT: control target
= control target key end

     0   :  { %s22_s0 = inlined_call_operand.vmem [shape: f32[16], index: 0, kind: input, shape index: {}]   ;;  %s23_s1 = inlined_call_operand.vmem [shape: f32[8,16], index: 1, kind: output, shape index: {}]  }
   0x1   :  { %v4_v0 = vld [vmem:[%s22_s0] ss:$0 sm:$0xff] }
   0x2   :  { %5 = vst [vmem:[%s23_s1] sm:$0xff] %v4_v0 }

// kernel: mul.22
= control target key start
LH: loop header
LB: loop body
LE: loop exit
PB: predicated region body
PF: predicated region fallthrough
CT: control target
= control target key end

     0   :  { %s67_s10 = smov 112   ;;  %s68_s11 = smov 80   ;;  %vm3_vm0 = vcmask 130048   ;;  %vm9_vm1 = vcmask 1048448   ;;  %vm15_vm2 = vcmask 917248   ;;  %vm21_vm3 = vcmask 786048   ;;  %s111_s0 = inlined_call_operand.vmem [shape: f32[8,16], index: 0, kind: input, shape index: {}]   ;;  %s112_s1 = inlined_call_operand.vmem [shape: f32[128], index: 1, kind: output, shape index: {}]  }
   0x1   :  { %v53_v0 = vld [vmem:[%s111_s0 + $0x7] sm:$0x1]   ;;  %v55_v1 = vld [vmem:[%s111_s0 + $0x5] sm:$0x1]   ;;  %v54_v2 = vld [vmem:[%s111_s0 + $0x6] sm:$0x1]  }
   0x2   :  { %7 = vrot.lane.b32.xlu0 %v53_v0, %s67_s10  ;;  %19 = vrot.lane.b32.xlu1 %v55_v1, %s68_s11  ;;  %v56_v3 = vld [vmem:[%s111_s0 + $0x4] sm:$0x1]   ;;  %v2_v4 = vld [vmem:[%s111_s0] sm:$0x1]   ;;  %s69_s18 = smov 96   ;;  %s70_s19 = smov 64  }
   0x3   :  { %4 = vst.msk [vmem:[#allocation0] sm:$0x1] %vm3_vm0, %v2_v4   ;;  %v57_v5 = vld [vmem:[%s111_s0 + $0x3] sm:$0x1]   ;;  %v58_v6 = vld [vmem:[%s111_s0 + $0x2] sm:$0x1]  }
   0x4   :  { %s71_s24 = smov 48   ;;  %s72_s25 = smov 32   ;;  %v59_v7 = vld [vmem:[%s111_s0 + $0x1] sm:$0x1]   ;;  %vm27_vm4 = vcmask 654848   ;;  %vm33_vm5 = vcmask 523648  }
   0x5   :  { %s73_s0 = smov 16   ;;  %vm39_vm6 = vcmask 392448   ;;  %vm45_vm7 = vcmask 261248  }
   0x6   :  { %13 = vrot.lane.b32.xlu0 %v54_v2, %s69_s18  ;;  %25 = vrot.lane.b32.xlu1 %v56_v3, %s70_s19 }
   0xa   :  { %31 = vrot.lane.b32.xlu0 %v57_v5, %s71_s24  ;;  %37 = vrot.lane.b32.xlu1 %v58_v6, %s72_s25 }
   0xe   :  { %43 = vrot.lane.b32.xlu0 %v59_v7, %s73_s0 }
  0x74   :  { %v8_v8 = vpop.permute.xlu0 %7   ;;  %v20_v9 = vpop.permute.xlu1 %19  }
  0x75   :  { %10 = vst.msk [vmem:[#allocation0] sm:$0x1] %vm9_vm1, %v8_v8  }
  0x78   :  { %v14_v10 = vpop.permute.xlu0 %13   ;;  %v26_v11 = vpop.permute.xlu1 %25  }
  0x79   :  { %16 = vst.msk [vmem:[#allocation0] sm:$0x1] %vm15_vm2, %v14_v10  }
  0x7a   :  { %22 = vst.msk [vmem:[#allocation0] sm:$0x1] %vm21_vm3, %v20_v9  }
  0x7b   :  { %28 = vst.msk [vmem:[#allocation0] sm:$0x1] %vm27_vm4, %v26_v11  }
  0x7c   :  { %v32_v12 = vpop.permute.xlu0 %31   ;;  %v38_v13 = vpop.permute.xlu1 %37  }
  0x7d   :  { %34 = vst.msk [vmem:[#allocation0] sm:$0x1] %vm33_vm5, %v32_v12  }
  0x7e   :  { %40 = vst.msk [vmem:[#allocation0] sm:$0x1] %vm39_vm6, %v38_v13  }
  0x80   :  { %v44_v14 = vpop.permute.xlu0 %43  }
  0x81   :  { %46 = vst.msk [vmem:[#allocation0] sm:$0x1] %vm45_vm7, %v44_v14  }
  0x88   :  { %v50_v15 = vld [vmem:[#allocation0] sm:$0x1] }
  0x89   :  { %52 = vst [vmem:[%s112_s1] sm:$0x1] %v50_v15 }

// kernel: tile.19
= control target key start
LH: loop header
LB: loop body
LE: loop exit
PB: predicated region body
PF: predicated region fallthrough
CT: control target
= control target key end

     0   :  { %s67_s10 = smov 112   ;;  %s68_s11 = smov 80   ;;  %vm3_vm0 = vcmask 130048   ;;  %vm9_vm1 = vcmask 1048448   ;;  %vm15_vm2 = vcmask 917248   ;;  %vm21_vm3 = vcmask 786048   ;;  %s111_s0 = inlined_call_operand.vmem [shape: f32[8,16], index: 0, kind: input, shape index: {}]   ;;  %s112_s1 = inlined_call_operand.vmem [shape: f32[1,128], index: 1, kind: output, shape index: {}]  }
   0x1   :  { %v53_v0 = vld [vmem:[%s111_s0 + $0x7] sm:$0x1]   ;;  %v55_v1 = vld [vmem:[%s111_s0 + $0x5] sm:$0x1]   ;;  %v54_v2 = vld [vmem:[%s111_s0 + $0x6] sm:$0x1]  }
   0x2   :  { %7 = vrot.lane.b32.xlu0 %v53_v0, %s67_s10  ;;  %19 = vrot.lane.b32.xlu1 %v55_v1, %s68_s11  ;;  %v56_v3 = vld [vmem:[%s111_s0 + $0x4] sm:$0x1]   ;;  %v2_v4 = vld [vmem:[%s111_s0] sm:$0x1]   ;;  %s69_s18 = smov 96   ;;  %s70_s19 = smov 64  }
   0x3   :  { %4 = vst.msk [vmem:[#allocation0] sm:$0x1] %vm3_vm0, %v2_v4   ;;  %v57_v5 = vld [vmem:[%s111_s0 + $0x3] sm:$0x1]   ;;  %v58_v6 = vld [vmem:[%s111_s0 + $0x2] sm:$0x1]  }
   0x4   :  { %s71_s24 = smov 48   ;;  %s72_s25 = smov 32   ;;  %v59_v7 = vld [vmem:[%s111_s0 + $0x1] sm:$0x1]   ;;  %vm27_vm4 = vcmask 654848   ;;  %vm33_vm5 = vcmask 523648  }
   0x5   :  { %s73_s0 = smov 16   ;;  %vm39_vm6 = vcmask 392448   ;;  %vm45_vm7 = vcmask 261248  }
   0x6   :  { %13 = vrot.lane.b32.xlu0 %v54_v2, %s69_s18  ;;  %25 = vrot.lane.b32.xlu1 %v56_v3, %s70_s19 }
   0xa   :  { %31 = vrot.lane.b32.xlu0 %v57_v5, %s71_s24  ;;  %37 = vrot.lane.b32.xlu1 %v58_v6, %s72_s25 }
   0xe   :  { %43 = vrot.lane.b32.xlu0 %v59_v7, %s73_s0 }
  0x74   :  { %v8_v8 = vpop.permute.xlu0 %7   ;;  %v20_v9 = vpop.permute.xlu1 %19  }
  0x75   :  { %10 = vst.msk [vmem:[#allocation0] sm:$0x1] %vm9_vm1, %v8_v8  }
  0x78   :  { %v14_v10 = vpop.permute.xlu0 %13   ;;  %v26_v11 = vpop.permute.xlu1 %25  }
  0x79   :  { %16 = vst.msk [vmem:[#allocation0] sm:$0x1] %vm15_vm2, %v14_v10  }
  0x7a   :  { %22 = vst.msk [vmem:[#allocation0] sm:$0x1] %vm21_vm3, %v20_v9  }
  0x7b   :  { %28 = vst.msk [vmem:[#allocation0] sm:$0x1] %vm27_vm4, %v26_v11  }
  0x7c   :  { %v32_v12 = vpop.permute.xlu0 %31   ;;  %v38_v13 = vpop.permute.xlu1 %37  }
  0x7d   :  { %34 = vst.msk [vmem:[#allocation0] sm:$0x1] %vm33_vm5, %v32_v12  }
  0x7e   :  { %40 = vst.msk [vmem:[#allocation0] sm:$0x1] %vm39_vm6, %v38_v13  }
  0x80   :  { %v44_v14 = vpop.permute.xlu0 %43  }
  0x81   :  { %46 = vst.msk [vmem:[#allocation0] sm:$0x1] %vm45_vm7, %v44_v14  }
  0x88   :  { %v50_v15 = vld [vmem:[#allocation0] sm:$0x1] }
  0x89   :  { %52 = vst [vmem:[%s112_s1] sm:$0x1] %v50_v15 }

// kernel: tu_layer_forward.1
= control target key start
LH: loop header
LB: loop body
LE: loop exit
PB: predicated region body
PF: predicated region fallthrough
CT: control target
= control target key end

     0   :  { %s857_s21 = smov 0   ;;  %s964_s0 = inlined_call_operand.vmem [shape: f32[128,16], index: 0, kind: input, shape index: {}]   ;;  %s965_s1 = inlined_call_operand.vmem [shape: f32[128,64], index: 1, kind: input, shape index: {}]   ;;  %s966_s2 = inlined_call_operand.vmem [shape: f32[16,128], index: 2, kind: input, shape index: {}]   ;;  %s967_s3 = inlined_call_operand.vmem [shape: f32[64,128], index: 3, kind: input, shape index: {}]   ;;  %s968_s4 = inlined_call_operand.vmem [shape: f32[1,128], index: 4, kind: input, shape index: {}]   ;;  %s969_s5 = inlined_call_operand.vmem [shape: f32[1,128], index: 5, kind: input, shape index: {}]   ;;  %s970_s6 = inlined_call_operand.vmem [shape: f32[128,128], index: 6, kind: output, shape index: {}]  }
   0x1 LB: > { %s677_s22 = sadd.s32 4294967295, %s820_s21   ;;  %p681_p0 = scmp.ge.s32.totalorder %s820_s21, 1  ;;  %s820_s21 = sphi %s857_s21, %s16_s21  }
   0x2   : > { %p224_p1 = scmp.lt.s32.totalorder %s820_s21, 3 }
   0x4   : > { %p225_p2 = pnand %p681_p0, %p224_p1 }
   0x5   : > { %v295_v0 = vld [vmem:[%s967_s3] sm:$0xff] (!%p225_p2)  ;;  %v296_v1 = vld [vmem:[%s967_s3 + $0x8] sm:$0xff] (!%p225_p2)  ;;  %s682_s29 = sshll.u32 (!%p225_p2), %s677_s22, 3  ;;  %v297_v5 = vld [vmem:[%s967_s3 + $0x10] sm:$0xff] (!%p225_p2)  ;;  %vm310_vm0 = vcmask (!%p225_p2), 130048   ;;  %vm455_vm1 = vcmask (!%p225_p2), 523264  }
   0x6   : > { %228 = sbr.rel (%p225_p2) target bundleno = 254 (0xfe), region = 44  ;;  %v285_v2 = vld [vmem:[%s966_s2] sm:$0xff] (!%p225_p2)  ;;  %v782_v3 = vpack.c.bf16 (!%p225_p2), %v296_v1, %v295_v0  ;;  %v286_v4 = vld [vmem:[%s966_s2 + $0x8] sm:$0xff] (!%p225_p2)  ;;  %v298_v6 = vld [vmem:[%s967_s3 + $0x18] sm:$0xff] (!%p225_p2)  ;;  %p260_p3 = scmp.lt.s32.totalorder (!%p225_p2), %s682_s29, 15 }
   0x7   : > { %v778_v7 = vpack.c.bf16 (!%p225_p2), %v286_v4, %v285_v2  ;;  %v786_v8 = vpack.c.bf16 (!%p225_p2), %v298_v6, %v297_v5  ;;  %v299_v9 = vld [vmem:[%s967_s3 + $0x20] sm:$0xff] (!%p225_p2)  ;;  %v300_v10 = vld [vmem:[%s967_s3 + $0x28] sm:$0xff] (!%p225_p2)  ;;  %v301_v12 = vld [vmem:[%s967_s3 + $0x30] sm:$0xff] (!%p225_p2) }
   0x8   : > { %798 = vmatprep.subr.bf16.mxu1 (!%p225_p2), %v782_v3  ;;  %v790_v11 = vpack.c.bf16 (!%p225_p2), %v300_v10, %v299_v9  ;;  %v302_v13 = vld [vmem:[%s967_s3 + $0x38] sm:$0xff] (!%p225_p2)  ;;  %v688_v35 = vld [vmem:[%s968_s4] ss:$0 sm:$0xff] (!%p225_p2) }
   0x9   : > { %802 = vmatpush3.bf16.msra.mxu1 (!%p225_p2), %v782_v3  ;;  %779 = vmatprep.subr.bf16.mxu0 (!%p225_p2), %v778_v7  ;;  %v794_v17 = vpack.c.bf16 (!%p225_p2), %v302_v13, %v301_v12  ;;  %v697_v37 = vld [vmem:[%s969_s5] ss:$0 sm:$0xff] (!%p225_p2) }
   0xa   : > { %781 = vmatpush3.bf16.msra.mxu0 (!%p225_p2), %v778_v7  ;;  %799 = vmatprep.subr.bf16.mxu1 (!%p225_p2), %v786_v8 }
   0xb   : > { %783 = vmatprep.subr.bf16.mxu0 (!%p225_p2), %v782_v3 }
   0xd   : > { %s972_s29 = smov (!%p260_p3, %s682_s29), 15  ;;  %803 = vmatpush3.bf16.msra.mxu1 %v786_v8 }
   0xe   : > { %s889_s16 = sshll.u32 %s972_s29, 3  ;;  %800 = vmatprep.subr.bf16.mxu1 %v790_v11 }
   0xf   : > { %s895_s19 = scalar_lea.vmem %s964_s0, %s889_s16  ;;  %s907_s27 = scalar_lea.vmem %s965_s1, %s889_s16 }
  0x10   : > { %v277_v14 = vld [vmem:[%s895_s19] sm:$0xff]  ;;  %v278_v15 = vld [vmem:[%s895_s19 + $0x8] sm:$0xff]  ;;  %v279_v16 = vld [vmem:[%s895_s19 + $0x10] sm:$0xff]  ;;  %s951_s10 = scalar_lea.vmem %s970_s6, %s889_s16 }
  0x11   : > { %738 = vmatprep.mubr.msk.f32.mxu0 %vm310_vm0, %v277_v14  ;;  %v289_v18 = vld [vmem:[%s907_s27 + $0x10] sm:$0xff]  ;;  %v280_v19 = vld [vmem:[%s895_s19 + $0x18] sm:$0xff]  ;;  %v281_v20 = vld [vmem:[%s895_s19 + $0x20] sm:$0xff]  ;;  %804 = vmatpush3.bf16.msra.mxu1 %v790_v11 }
  0x12   : > { %739 = vmatmul.mubr.msk.f32.vlgmr.msra.gmra.mrb[0].mxu0 %vm310_vm0, %v278_v15  ;;  %769 = vmatprep.mubr.msk.f32.mxu1 %vm455_vm1, %v289_v18  ;;  %v282_v21 = vld [vmem:[%s895_s19 + $0x28] sm:$0xff]  ;;  %v283_v22 = vld [vmem:[%s895_s19 + $0x30] sm:$0xff]  ;;  %v290_v23 = vld [vmem:[%s907_s27 + $0x18] sm:$0xff] }
  0x13   : > { %785 = vmatpush3.bf16.msra.mxu0 %v782_v3  ;;  %741 = vmatprep.mubr.msk.f32.mxu0 %vm310_vm0, %v279_v16  ;;  %v291_v24 = vld [vmem:[%s907_s27 + $0x20] sm:$0xff]  ;;  %v284_v25 = vld [vmem:[%s895_s19 + $0x38] sm:$0xff]  ;;  %v292_v27 = vld [vmem:[%s907_s27 + $0x28] sm:$0xff] }
  0x14   : > { %787 = vmatprep.subr.bf16.mxu0 %v786_v8  ;;  %801 = vmatprep.subr.bf16.mxu1 %v794_v17  ;;  %v287_v26 = vld [vmem:[%s907_s27] sm:$0xff]  ;;  %v293_v28 = vld [vmem:[%s907_s27 + $0x30] sm:$0xff]  ;;  %v288_v29 = vld [vmem:[%s907_s27 + $0x8] sm:$0xff] }
  0x15   : > { %805 = vmatpush3.bf16.msra.mxu1 %v794_v17  ;;  %v294_v30 = vld [vmem:[%s907_s27 + $0x38] sm:$0xff] }
  0x16   : > { %742 = vmatmul.mubr.msk.f32.gmra.mrb[2].mxu0 %vm310_vm0, %v280_v19 }
  0x17   : > { %789 = vmatpush3.bf16.msra.mxu0 %v786_v8  ;;  %744 = vmatprep.mubr.msk.f32.mxu0 %vm310_vm0, %v281_v20 }
  0x18   : > { %791 = vmatprep.subr.bf16.mxu0 %v790_v11  ;;  %770 = vmatmul.mubr.msk.f32.vlgmr.msra.gmra.mrb[0].mxu1 %vm455_vm1, %v290_v23 }
  0x19   : > { %772 = vmatprep.mubr.msk.f32.mxu1 %vm455_vm1, %v291_v24 }
  0x1a   : > { %745 = vmatmul.mubr.msk.f32.gmra.mrb[4].mxu0 %vm310_vm0, %v282_v21 }
  0x1b   : > { %793 = vmatpush3.bf16.msra.mxu0 %v790_v11  ;;  %747 = vmatprep.mubr.msk.f32.mxu0 %vm310_vm0, %v283_v22 }
  0x1c   : > { %795 = vmatprep.subr.bf16.mxu0 %v794_v17  ;;  %773 = vmatmul.mubr.msk.f32.gmra.mrb[2].mxu1 %vm455_vm1, %v292_v27 }
  0x1d   : > { %775 = vmatprep.mubr.msk.f32.mxu1 %vm455_vm1, %v293_v28 }
  0x1e   : > { %748 = vmatmul.mubr.msk.f32.gmra.mrb[6].mxu0 %vm310_vm0, %v284_v25 }
  0x1f   : > { %797 = vmatpush3.bf16.msra.mxu0 %v794_v17  ;;  %766 = vmatprep.mubr.msk.f32.mxu0 %vm455_vm1, %v287_v26 }
  0x20   : > { %776 = vmatmul.mubr.msk.f32.gmra.mrb[4].mxu1 %vm455_vm1, %v294_v30 }
  0x22   : > { %767 = vmatmul.mubr.msk.f32.vlgmr.msra.gmra.mrb[8].mxu0 %vm455_vm1, %v288_v29 }
  0xe5   : > { %v740_v31 = vpop.f32.mrb[0].mxu0 }
  0xe6   : > { %v401_v32 = vpop.f32.mrb[1].mxu0  ;;  %v407_v54 = vadd.f32 %v740_v31, %v688_v35 }
  0xe7   : > { %v402_v58 = vadd.f32 %v688_v35, %v401_v32 }
  0xe8   : > { %v441_v8 = vmax.f32 %v407_v54, 0.0 }
  0xe9   : > { %v743_v33 = vpop.f32.mrb[2].mxu0  ;;  %v440_v13 = vmax.f32 %v402_v58, 0.0 }
  0xea   : > { %v411_v34 = vpop.f32.mrb[3].mxu0  ;;  %v417_v38 = vadd.f32 %v743_v33, %v688_v35 }
  0xeb   : > { %v412_v40 = vadd.f32 %v688_v35, %v411_v34  ;;  %v771_v41 = vpop.f32.mrb[0].mxu1 }
  0xec   : > { %v562_v42 = vadd.f32 %v771_v41, %v697_v37  ;;  %v556_v43 = vpop.f32.mrb[1].mxu1  ;;  %v443_v46 = vmax.f32 %v417_v38, 0.0 }
  0xed   : > { %v746_v36 = vpop.f32.mrb[4].mxu0  ;;  %v557_v44 = vadd.f32 %v697_v37, %v556_v43  ;;  %v442_v50 = vmax.f32 %v412_v40, 0.0 }
  0xee   : > { %v421_v39 = vpop.f32.mrb[5].mxu0  ;;  %v427_v47 = vadd.f32 %v746_v36, %v688_v35  ;;  %v588_v48 = vmax.f32 %v562_v42, 0.0 }
  0xef   : > { %v422_v51 = vadd.f32 %v688_v35, %v421_v39  ;;  %v587_v52 = vmax.f32 %v557_v44, 0.0  ;;  %v774_v53 = vpop.f32.mrb[2].mxu1 }
  0xf0   : > { %v596_v55 = vadd.f32 %v588_v48, %v443_v46  ;;  %v572_v56 = vadd.f32 %v774_v53, %v697_v37  ;;  %v566_v57 = vpop.f32.mrb[3].mxu1  ;;  %v445_v62 = vmax.f32 %v427_v47, 0.0 }
  0xf1   : > { %v749_v45 = vpop.f32.mrb[6].mxu0  ;;  %v595_v59 = vadd.f32 %v587_v52, %v442_v50  ;;  %v567_v60 = vadd.f32 %v697_v37, %v566_v57  ;;  %v444_v3 = vmax.f32 %v422_v51, 0.0 }
  0xf2   : > { %v431_v49 = vpop.f32.mrb[7].mxu0  ;;  %604 = vst [vmem:[%s951_s10 + $0x18] sm:$0xff] %v596_v55  ;;  %v437_v63 = vadd.f32 %v749_v45, %v688_v35  ;;  %v590_v0 = vmax.f32 %v572_v56, 0.0 }
  0xf3   : > { %603 = vst [vmem:[%s951_s10 + $0x10] sm:$0xff] %v595_v59  ;;  %v432_v4 = vadd.f32 %v688_v35, %v431_v49  ;;  %v589_v5 = vmax.f32 %v567_v60, 0.0  ;;  %v777_v7 = vpop.f32.mrb[4].mxu1 }
  0xf4   : > { %v598_v9 = vadd.f32 %v590_v0, %v445_v62  ;;  %v582_v11 = vadd.f32 %v777_v7, %v697_v37  ;;  %v576_v12 = vpop.f32.mrb[5].mxu1  ;;  %v447_v17 = vmax.f32 %v437_v63, 0.0 }
  0xf5   : > { %v768_v61 = vpop.f32.mrb[8].mxu0  ;;  %v597_v14 = vadd.f32 %v589_v5, %v444_v3  ;;  %v577_v16 = vadd.f32 %v697_v37, %v576_v12  ;;  %v446_v20 = vmax.f32 %v432_v4, 0.0 }
  0xf6   : > { %v552_v1 = vadd.f32 %v768_v61, %v697_v37  ;;  %v546_v2 = vpop.f32.mrb[9].mxu0  ;;  %606 = vst [vmem:[%s951_s10 + $0x28] sm:$0xff] %v598_v9  ;;  %v592_v19 = vmax.f32 %v582_v11, 0.0 }
  0xf7   : > { %v547_v6 = vadd.f32 %v697_v37, %v546_v2  ;;  %605 = vst [vmem:[%s951_s10 + $0x20] sm:$0xff] %v597_v14  ;;  %v591_v22 = vmax.f32 %v577_v16, 0.0 }
  0xf8   : > { %v586_v10 = vmax.f32 %v552_v1, 0.0  ;;  %v600_v23 = vadd.f32 %v592_v19, %v447_v17 }
  0xf9   : > { %v585_v15 = vmax.f32 %v547_v6, 0.0  ;;  %v599_v24 = vadd.f32 %v591_v22, %v446_v20 }
  0xfa   : > { %v594_v18 = vadd.f32 %v586_v10, %v441_v8  ;;  %608 = vst [vmem:[%s951_s10 + $0x38] sm:$0xff] %v600_v23 }
  0xfb   : > { %v593_v21 = vadd.f32 %v585_v15, %v440_v13  ;;  %607 = vst [vmem:[%s951_s10 + $0x30] sm:$0xff] %v599_v24 }
  0xfc   : > { %602 = vst [vmem:[%s951_s10 + $0x8] sm:$0xff] %v594_v18 }
  0xfd   : > { %601 = vst [vmem:[%s951_s10] sm:$0xff] %v593_v21 }
  0xfe PF: > { %s16_s21 = sadd.s32 1, %s820_s21  }
  0xff   : > { %p13_p4 = scmp.ge.s32.totalorder %s16_s21, 4  }
 0x101   :  { %15 = sbr.rel (!%p13_p4) target bundleno = 1 (0x1), region = 77 }

</bundles_post_ra>
